<compile_context>
chip_gen: v7x
topology: tpu7x:2x2x1
jax: 0.10.0
libtpu: 0.0.40
codegen_flags: <defaults>
</compile_context>

<pallas_src>
import functools
import math

import jax
import jax.numpy as jnp
from jax.experimental import pallas as pl
from jax.experimental.pallas import tpu as pltpu


# ----------------------------------------------------------------------------- kernel


def _self_attention_kernel(x_ref, w_ref, out_ref, attn_ref, q_sc, k_sc, v_sc, *, tanh_dtype):
    # x_ref:    (Bt, S, H)   activations, full sequence for this batch block
    # w_ref:    (H, 3H) fused bf16 weights  OR  (3, H, H) stacked bf16 weights
    # out_ref:  (Bt, Tq, H)  attention-output tile
    # attn_ref: (Bt, Tq, S)  post-softmax attention-weights tile
    # q_sc/k_sc/v_sc: (Bt, S, H) bf16 scratch caching the projections across q-tiles
    Bt, S, H = x_ref.shape
    Tq = out_ref.shape[1]
    qi = pl.program_id(1)
    inv_scale = 1.0 / math.sqrt(float(H))

    # --- Q/K/V projection + tanh: computed once per batch block (first q-tile), cached bf16.
    @pl.when(qi == 0)
    def _project():
        x2d = x_ref[...].reshape(Bt * S, H).astype(jnp.bfloat16)
        if len(w_ref.shape) == 2:
            # Fused projection: one (Bt*S, H) @ (H, 3H) MXU matmul; H % 128 == 0 so the
            # q/k/v slices below are lane-tile aligned (no hidden VMEM relayout).
            proj = jnp.dot(x2d, w_ref[...], preferred_element_type=jnp.float32)
            qf, kf, vf = proj[:, :H], proj[:, H:2 * H], proj[:, 2 * H:]
        else:
            qf = jnp.dot(x2d, w_ref[0], preferred_element_type=jnp.float32)
            kf = jnp.dot(x2d, w_ref[1], preferred_element_type=jnp.float32)
            vf = jnp.dot(x2d, w_ref[2], preferred_element_type=jnp.float32)
        # tanh in bf16 on v6e/v7x (EUP bf16 path), f32 on v5e.  1/sqrt(H) folded into Q.
        q = jnp.tanh(qf.astype(tanh_dtype)) * inv_scale
        k = jnp.tanh(kf.astype(tanh_dtype))
        v = jnp.tanh(vf.astype(tanh_dtype))
        q_sc[...] = q.reshape(Bt, S, H).astype(jnp.bfloat16)
        k_sc[...] = k.reshape(Bt, S, H).astype(jnp.bfloat16)
        v_sc[...] = v.reshape(Bt, S, H).astype(jnp.bfloat16)

    # --- Attention for this query tile (full key axis is resident, so no online softmax).
    q_start = pl.multiple_of(qi * Tq, Tq)
    q_tile = q_sc[:, pl.ds(q_start, Tq), :]                  # (Bt, Tq, H) bf16, pre-scaled
    k = k_sc[...]                                            # (Bt, S, H)  bf16
    v = v_sc[...]

    # scores = (Q / sqrt(H)) @ K^T, batched over Bt; bf16 operands, f32 accumulation.
    scores = jnp.einsum("bqd,bkd->bqk", q_tile, k,
                        preferred_element_type=jnp.float32)  # (Bt, Tq, S) f32

    # Numerically stable softmax; elementwise math stays f32, reciprocal -> EUP slot.
    m = jnp.max(scores, axis=-1, keepdims=True)
    e = jnp.exp(scores - m)
    denom = jnp.sum(e, axis=-1, keepdims=True)
    attn = e * pl.reciprocal(denom, approx=True)             # rows sum to 1 to ~2^-12 rel.

    # TODO(synk): nn.Dropout(0.1) is identity in eval mode; training-mode RNG dropout not reproduced.

    out = jnp.einsum("bqk,bkd->bqd", attn.astype(jnp.bfloat16), v,
                     preferred_element_type=jnp.float32)     # (Bt, Tq, H) f32

    out_ref[...] = out.astype(out_ref.dtype)
    attn_ref[...] = attn.astype(attn_ref.dtype)


# ----------------------------------------------------------------------------- block sizing


def _device_kind():
    try:
        return jax.devices()[0].device_kind.lower()
    except Exception:
        return ""


def _largest_divisor_leq(n, cap):
    cap = max(1, min(n, cap))
    for t in range(cap, 0, -1):
        if n % t == 0:
            return t
    return 1


def _vmem_footprint(bb, tq, S, H, x_bytes, out_bytes, attn_bytes):
    xb = 2 * bb * S * H * x_bytes                # x block, double-buffered
    wb = 2 * 3 * H * H * 2                       # bf16 weights (conservatively assume 2 buffers)
    ob = 2 * bb * tq * H * out_bytes             # out tile, double-buffered
    ab = 2 * bb * tq * S * attn_bytes            # attn tile, double-buffered
    sc = 3 * bb * S * H * 2                      # bf16 q/k/v scratch cache
    proj_tmp = bb * S * 3 * H * 4                # f32 projection intermediates (q-tile 0 only)
    attn_tmp = 3 * bb * tq * S * 4               # f32 scores / e / attn intermediates
    return xb + wb + ob + ab + sc + max(proj_tmp, attn_tmp) + (2 << 20)


def _pick_blocks(B, S, H, x_bytes, out_bytes, attn_bytes):
    kind = _device_kind()
    is_v5e = ("v5 lite" in kind) or ("v5e" in kind)
    is_v7 = "v7" in kind

    budget = 36 << 20                            # keep per-step footprint well under v7x's 64 MiB/TC
    target_rows = 256 if is_v5e else (512 if is_v7 else 768)

    tq = _largest_divisor_leq(S, 512)            # query tile bounds the S^2 f32 intermediates

    bb = max(1, min(B, target_rows // max(S, 1)))
    if is_v7 and B >= 2:
        bb = min(bb, max(1, B // 2))             # keep >=2 parallel steps only where there are 2 TCs
    bb = _largest_divisor_leq(B, bb)

    while bb > 1 and _vmem_footprint(bb, tq, S, H, x_bytes, out_bytes, attn_bytes) > budget:
        bb = _largest_divisor_leq(B, bb - 1)
    while tq > 8 and _vmem_footprint(bb, tq, S, H, x_bytes, out_bytes, attn_bytes) > budget:
        tq = _largest_divisor_leq(S, max(tq // 2, 1))

    fp = _vmem_footprint(bb, tq, S, H, x_bytes, out_bytes, attn_bytes)
    vmem_limit = int(min(max(int(fp * 1.25), 48 << 20), 112 << 20))
    return bb, tq, vmem_limit


# ----------------------------------------------------------------------------- wrapper


def self_attention(x, wq, wk, wv, *, attn_dtype=None, block_b=None, block_q=None):
    """x: (B, S, H); wq/wk/wv: (H, H) in PyTorch nn.Linear layout (out_features, in_features).

    Returns (attn_output (B, S, H) in x.dtype, attn_weights (B, S, S) in attn_dtype or x.dtype).
    """
    B, S, H = x.shape
    out_dtype = x.dtype
    attn_dtype = out_dtype if attn_dtype is None else attn_dtype

    kind = _device_kind()
    is_v5e = ("v5 lite" in kind) or ("v5e" in kind)
    tanh_dtype = jnp.float32 if is_v5e else jnp.bfloat16

    bb_auto, tq_auto, vmem_limit = _pick_blocks(
        B, S, H,
        x_bytes=jnp.dtype(x.dtype).itemsize,
        out_bytes=jnp.dtype(out_dtype).itemsize,
        attn_bytes=jnp.dtype(attn_dtype).itemsize)
    block_b = bb_auto if block_b is None else block_b
    block_q = tq_auto if block_q is None else block_q
    assert B % block_b == 0, "block_b must divide batch"
    assert S % block_q == 0, "block_q must divide seq_len"

    # One-time host-side weight prep (PyTorch Linear applies W^T -> pre-transpose, cast bf16).
    fused = (H % 128 == 0)
    if fused:
        w = jnp.concatenate([wq.T, wk.T, wv.T], axis=1).astype(jnp.bfloat16)   # (H, 3H)
        w_block, w_index = (H, 3 * H), (lambda b, q: (0, 0))
    else:
        w = jnp.stack([wq.T, wk.T, wv.T], axis=0).astype(jnp.bfloat16)          # (3, H, H)
        w_block, w_index = (3, H, H), (lambda b, q: (0, 0, 0))

    grid = (B // block_b, S // block_q)

    x_spec = pl.BlockSpec((block_b, S, H), lambda b, q: (b, 0, 0))
    out_spec = pl.BlockSpec((block_b, block_q, H), lambda b, q: (b, q, 0))
    attn_spec = pl.BlockSpec((block_b, block_q, S), lambda b, q: (b, q, 0))

    kernel = functools.partial(_self_attention_kernel, tanh_dtype=tanh_dtype)

    cost = pl.CostEstimate(
        flops=2 * B * S * H * 3 * H + 4 * B * S * S * H,
        transcendentals=3 * B * S * H + B * S * S,
        bytes_accessed=(x.size * x.dtype.itemsize + w.size * 2
                        + B * S * H * jnp.dtype(out_dtype).itemsize
                        + B * S * S * jnp.dtype(attn_dtype).itemsize),
    )

    def build(single_buffer_weights):
        if single_buffer_weights:
            # Constant index_map: double-buffering the weights buys nothing; single-buffer
            # frees 3*H^2*2 bytes of VMEM for bigger activation tiles.
            w_spec = pl.BlockSpec(w_block, w_index, pipeline_mode=pl.Buffered(1))
        else:
            w_spec = pl.BlockSpec(w_block, w_index)
        return pl.pallas_call(
            kernel,
            out_shape=(
                jax.ShapeDtypeStruct((B, S, H), out_dtype),
                jax.ShapeDtypeStruct((B, S, S), attn_dtype),
            ),
            grid=grid,
            in_specs=[x_spec, w_spec],
            out_specs=(out_spec, attn_spec),
            scratch_shapes=[pltpu.VMEM((block_b, S, H), jnp.bfloat16)] * 3,
            compiler_params=pltpu.CompilerParams(
                dimension_semantics=("parallel", "arbitrary"),
                vmem_limit_bytes=vmem_limit,
            ),
            cost_estimate=cost,
        )

    try:
        return build(True)(x, w)
    except Exception:
        # pipeline_mode=pl.Buffered(1) not supported on this path/version: fall back to the
        # default double-buffered weight block (identical results, slightly more VMEM).
        return build(False)(x, w)


# ----------------------------------------------------------------------------- reference & test


def _reference(x, wq, wk, wv):
    q = jnp.tanh(jnp.einsum("bsh,oh->bso", x, wq))
    k = jnp.tanh(jnp.einsum("bsh,oh->bso", x, wk))
    v = jnp.tanh(jnp.einsum("bsh,oh->bso", x, wv))
    scores = jnp.einsum("bqh,bkh->bqk", q, k) / math.sqrt(x.shape[-1])
    attn = jax.nn.softmax(scores, axis=-1)
    out = jnp.einsum("bqk,bkh->bqh", attn, v)
    return out, attn


if __name__ == "__main__":
    # Small shapes consistent with the module's forward: (batch, seq_len, hidden_dim)
    B, S, H = 2, 8, 32

    key = jax.random.PRNGKey(0)
    kx, kq, kk, kv = jax.random.split(key, 4)

    x = jax.random.normal(kx, (B, S, H), dtype=jnp.float32)
    # PyTorch nn.Linear default init scale ~ U(-1/sqrt(H), 1/sqrt(H)); deterministic synthetic weights
    bound = 1.0 / math.sqrt(H)
    wq = jax.random.uniform(kq, (H, H), dtype=jnp.float32, minval=-bound, maxval=bound)
    wk = jax.random.uniform(kk, (H, H), dtype=jnp.float32, minval=-bound, maxval=bound)
    wv = jax.random.uniform(kv, (H, H), dtype=jnp.float32, minval=-bound, maxval=bound)

    out, attn = self_attention(x, wq, wk, wv)
    jax.block_until_ready((out, attn))

    # Correctness check against the pure-f32 JAX reference.  The kernel feeds the MXU bf16
    # operands (f32 accumulation) and computes tanh at bf16 on v6e/v7x, so allow bf16-level tolerance.
    ref_out, ref_attn = _reference(x, wq, wk, wv)
    assert jnp.allclose(out, ref_out, atol=3e-2, rtol=3e-2), "attn_output mismatch"
    assert jnp.allclose(attn, ref_attn, atol=3e-2, rtol=3e-2), "attn_weights mismatch"

    print("KERNEL_OK")
</pallas_src>

<mosaic_0001>
module attributes {stable_mosaic.version = 11 : i64} {
  func.func @_self_attention_kernel(%arg0: i32, %arg1: i32, %arg2: memref<2x8x32xf32, #tpu.memory_space<vmem>>, %arg3: memref<3x32x32xbf16, #tpu.memory_space<vmem>>, %arg4: memref<2x8x32xf32, #tpu.memory_space<vmem>>, %arg5: memref<2x8x8xf32, #tpu.memory_space<vmem>>, %arg6: memref<2x8x32xbf16, #tpu.memory_space<vmem>>, %arg7: memref<2x8x32xbf16, #tpu.memory_space<vmem>>, %arg8: memref<2x8x32xbf16, #tpu.memory_space<vmem>>) attributes {dimension_semantics = [#tpu.dimension_semantics<parallel>, #tpu.dimension_semantics<arbitrary>], iteration_bounds = array<i64: 1, 1>, scalar_prefetch = 0 : i64, scratch_operands = 3 : i64, tpu.core_type = #tpu.core_type<tc>, window_params = [{transform_indices = @transform_0, window_bounds = array<i64: 2, 8, 32>}, {pipeline_mode = #tpu.pipeline_mode<synchronous>, transform_indices = @transform_1, window_bounds = array<i64: 3, 32, 32>}, {transform_indices = @transform_2, window_bounds = array<i64: 2, 8, 32>}, {transform_indices = @transform_3, window_bounds = array<i64: 2, 8, 8>}]} {
    %c0_i32 = arith.constant 0 : i32
    %0 = arith.cmpi eq, %arg1, %c0_i32 : i32
    %1 = arith.extui %0 : i1 to i32
    %c0_i32_0 = arith.constant 0 : i32
    %2 = arith.cmpi ne, %1, %c0_i32_0 : i32
    scf.if %2 {
      %c0_17 = arith.constant 0 : index
      %c0_18 = arith.constant 0 : index
      %c0_19 = arith.constant 0 : index
      %24 = vector.load %arg2[%c0_17, %c0_18, %c0_19] : memref<2x8x32xf32, #tpu.memory_space<vmem>>, vector<2x8x32xf32>
      %25 = vector.shape_cast %24 : vector<2x8x32xf32> to vector<16x32xf32>
      %26 = arith.truncf %25 : vector<16x32xf32> to vector<16x32xbf16>
      %c0_20 = arith.constant 0 : index
      %c0_21 = arith.constant 0 : index
      %c0_22 = arith.constant 0 : index
      %27 = vector.load %arg3[%c0_20, %c0_21, %c0_22] : memref<3x32x32xbf16, #tpu.memory_space<vmem>>, vector<1x32x32xbf16>
      %28 = vector.shape_cast %27 : vector<1x32x32xbf16> to vector<32x32xbf16>
      %cst_23 = arith.constant dense<0.000000e+00> : vector<16x32xf32>
      %29 = tpu.matmul %26, %28, %cst_23 {dimension_numbers = #tpu.dot_dimension_numbers<[1], [0], [0], [1], [0, 0, 1, 1], [], []>} : vector<16x32xbf16>, vector<32x32xbf16>, vector<16x32xf32> -> vector<16x32xf32>
      %c1 = arith.constant 1 : index
      %c0_24 = arith.constant 0 : index
      %c0_25 = arith.constant 0 : index
      %30 = vector.load %arg3[%c1, %c0_24, %c0_25] : memref<3x32x32xbf16, #tpu.memory_space<vmem>>, vector<1x32x32xbf16>
      %31 = vector.shape_cast %30 : vector<1x32x32xbf16> to vector<32x32xbf16>
      %cst_26 = arith.constant dense<0.000000e+00> : vector<16x32xf32>
      %32 = tpu.matmul %26, %31, %cst_26 {dimension_numbers = #tpu.dot_dimension_numbers<[1], [0], [0], [1], [0, 0, 1, 1], [], []>} : vector<16x32xbf16>, vector<32x32xbf16>, vector<16x32xf32> -> vector<16x32xf32>
      %c2 = arith.constant 2 : index
      %c0_27 = arith.constant 0 : index
      %c0_28 = arith.constant 0 : index
      %33 = vector.load %arg3[%c2, %c0_27, %c0_28] : memref<3x32x32xbf16, #tpu.memory_space<vmem>>, vector<1x32x32xbf16>
      %34 = vector.shape_cast %33 : vector<1x32x32xbf16> to vector<32x32xbf16>
      %cst_29 = arith.constant dense<0.000000e+00> : vector<16x32xf32>
      %35 = tpu.matmul %26, %34, %cst_29 {dimension_numbers = #tpu.dot_dimension_numbers<[1], [0], [0], [1], [0, 0, 1, 1], [], []>} : vector<16x32xbf16>, vector<32x32xbf16>, vector<16x32xf32> -> vector<16x32xf32>
      %36 = arith.truncf %29 : vector<16x32xf32> to vector<16x32xbf16>
      %37 = math.tanh %36 : vector<16x32xbf16>
      %cst_30 = arith.constant 1.767580e-01 : bf16
      %38 = vector.broadcast %cst_30 : bf16 to vector<16x32xbf16>
      %39 = arith.mulf %37, %38 : vector<16x32xbf16>
      %40 = arith.truncf %32 : vector<16x32xf32> to vector<16x32xbf16>
      %41 = math.tanh %40 : vector<16x32xbf16>
      %42 = arith.truncf %35 : vector<16x32xf32> to vector<16x32xbf16>
      %43 = math.tanh %42 : vector<16x32xbf16>
      %44 = vector.shape_cast %39 : vector<16x32xbf16> to vector<2x8x32xbf16>
      %c0_31 = arith.constant 0 : index
      %c0_32 = arith.constant 0 : index
      %c0_33 = arith.constant 0 : index
      %45 = vector.load %arg6[%c0_31, %c0_32, %c0_33] : memref<2x8x32xbf16, #tpu.memory_space<vmem>>, vector<2x8x32xbf16>
      tpu.vector_store %arg6[%c0_31, %c0_32, %c0_33], %44 {strides = array<i32>} : memref<2x8x32xbf16, #tpu.memory_space<vmem>>, vector<2x8x32xbf16>,
      %46 = vector.shape_cast %41 : vector<16x32xbf16> to vector<2x8x32xbf16>
      %c0_34 = arith.constant 0 : index
      %c0_35 = arith.constant 0 : index
      %c0_36 = arith.constant 0 : index
      %47 = vector.load %arg7[%c0_34, %c0_35, %c0_36] : memref<2x8x32xbf16, #tpu.memory_space<vmem>>, vector<2x8x32xbf16>
      tpu.vector_store %arg7[%c0_34, %c0_35, %c0_36], %46 {strides = array<i32>} : memref<2x8x32xbf16, #tpu.memory_space<vmem>>, vector<2x8x32xbf16>,
      %48 = vector.shape_cast %43 : vector<16x32xbf16> to vector<2x8x32xbf16>
      %c0_37 = arith.constant 0 : index
      %c0_38 = arith.constant 0 : index
      %c0_39 = arith.constant 0 : index
      %49 = vector.load %arg8[%c0_37, %c0_38, %c0_39] : memref<2x8x32xbf16, #tpu.memory_space<vmem>>, vector<2x8x32xbf16>
      tpu.vector_store %arg8[%c0_37, %c0_38, %c0_39], %48 {strides = array<i32>} : memref<2x8x32xbf16, #tpu.memory_space<vmem>>, vector<2x8x32xbf16>,
    } else {
    }
    %c8_i32 = arith.constant 8 : i32
    %3 = arith.muli %arg1, %c8_i32 : i32
    %4 = tpu.assume_multiple %3, 8 : i32
    %c0 = arith.constant 0 : index
    %5 = arith.index_cast %4 : i32 to index
    %c0_1 = arith.constant 0 : index
    %6 = vector.load %arg6[%c0, %5, %c0_1] : memref<2x8x32xbf16, #tpu.memory_space<vmem>>, vector<2x8x32xbf16>
    %c0_2 = arith.constant 0 : index
    %c0_3 = arith.constant 0 : index
    %c0_4 = arith.constant 0 : index
    %7 = vector.load %arg7[%c0_2, %c0_3, %c0_4] : memref<2x8x32xbf16, #tpu.memory_space<vmem>>, vector<2x8x32xbf16>
    %c0_5 = arith.constant 0 : index
    %c0_6 = arith.constant 0 : index
    %c0_7 = arith.constant 0 : index
    %8 = vector.load %arg8[%c0_5, %c0_6, %c0_7] : memref<2x8x32xbf16, #tpu.memory_space<vmem>>, vector<2x8x32xbf16>
    "tpu.trace_start"() <{level = 10 : i32, message = "bqd,bkd->bqk"}> : () -> ()
    %cst = arith.constant dense<0.000000e+00> : vector<2x8x8xf32>
    %9 = tpu.matmul %6, %7, %cst {dimension_numbers = #tpu.dot_dimension_numbers<[2], [2], [1], [1], [0, 0, 0, 1, 1, 1], [0], [0]>} : vector<2x8x32xbf16>, vector<2x8x32xbf16>, vector<2x8x8xf32> -> vector<2x8x8xf32>
    "tpu.trace_stop"() : () -> ()
    %cst_8 = arith.constant dense<0xFF800000> : vector<2x8xf32>
    %10 = vector.multi_reduction <maximumf>, %9, %cst_8 [2] : vector<2x8x8xf32> to vector<2x8xf32>
    %11 = vector.shape_cast %10 : vector<2x8xf32> to vector<2x8x1xf32>
    %12 = vector.broadcast %11 : vector<2x8x1xf32> to vector<2x8x8xf32>
    %13 = arith.subf %9, %12 : vector<2x8x8xf32>
    %14 = math.exp %13 : vector<2x8x8xf32>
    %cst_9 = arith.constant dense<0.000000e+00> : vector<2x8xf32>
    %15 = vector.multi_reduction <add>, %14, %cst_9 [2] : vector<2x8x8xf32> to vector<2x8xf32>
    %16 = vector.shape_cast %15 : vector<2x8xf32> to vector<2x8x1xf32>
    %17 = tpu.reciprocal %16 {approx = true} : vector<2x8x1xf32> -> vector<2x8x1xf32>
    %18 = vector.broadcast %17 : vector<2x8x1xf32> to vector<2x8x8xf32>
    %19 = arith.mulf %14, %18 : vector<2x8x8xf32>
    %20 = arith.truncf %19 : vector<2x8x8xf32> to vector<2x8x8xbf16>
    "tpu.trace_start"() <{level = 10 : i32, message = "bqk,bkd->bqd"}> : () -> ()
    %cst_10 = arith.constant dense<0.000000e+00> : vector<2x8x32xf32>
    %21 = tpu.matmul %20, %8, %cst_10 {dimension_numbers = #tpu.dot_dimension_numbers<[2], [1], [1], [2], [0, 0, 0, 1, 1, 2], [0], [0]>} : vector<2x8x8xbf16>, vector<2x8x32xbf16>, vector<2x8x32xf32> -> vector<2x8x32xf32>
    "tpu.trace_stop"() : () -> ()
    %c0_11 = arith.constant 0 : index
    %c0_12 = arith.constant 0 : index
    %c0_13 = arith.constant 0 : index
    %22 = vector.load %arg4[%c0_11, %c0_12, %c0_13] : memref<2x8x32xf32, #tpu.memory_space<vmem>>, vector<2x8x32xf32>
    tpu.vector_store %arg4[%c0_11, %c0_12, %c0_13], %21 {strides = array<i32>} : memref<2x8x32xf32, #tpu.memory_space<vmem>>, vector<2x8x32xf32>,
    %c0_14 = arith.constant 0 : index
    %c0_15 = arith.constant 0 : index
    %c0_16 = arith.constant 0 : index
    %23 = vector.load %arg5[%c0_14, %c0_15, %c0_16] : memref<2x8x8xf32, #tpu.memory_space<vmem>>, vector<2x8x8xf32>
    tpu.vector_store %arg5[%c0_14, %c0_15, %c0_16], %19 {strides = array<i32>} : memref<2x8x8xf32, #tpu.memory_space<vmem>>, vector<2x8x8xf32>,
    return
  }
  func.func @transform_0(%arg0: i32, %arg1: i32) -> (i32, i32, i32) {
    %c0_i32 = arith.constant 0 : i32
    %c0_i32_0 = arith.constant 0 : i32
    %c0_i32_1 = arith.constant 0 : i32
    return %arg0, %c0_i32, %c0_i32_0 : i32, i32, i32
  }
  func.func @transform_1(%arg0: i32, %arg1: i32) -> (i32, i32, i32) {
    %c0_i32 = arith.constant 0 : i32
    %c0_i32_0 = arith.constant 0 : i32
    %c0_i32_1 = arith.constant 0 : i32
    %c0_i32_2 = arith.constant 0 : i32
    return %c0_i32, %c0_i32_0, %c0_i32_1 : i32, i32, i32
  }
  func.func @transform_2(%arg0: i32, %arg1: i32) -> (i32, i32, i32) {
    %c0_i32 = arith.constant 0 : i32
    %c0_i32_0 = arith.constant 0 : i32
    return %arg0, %arg1, %c0_i32 : i32, i32, i32
  }
  func.func @transform_3(%arg0: i32, %arg1: i32) -> (i32, i32, i32) {
    %c0_i32 = arith.constant 0 : i32
    %c0_i32_0 = arith.constant 0 : i32
    return %arg0, %arg1, %c0_i32 : i32, i32, i32
  }
}

module attributes {stable_mosaic.version = 11 : i64} {
  func.func @_self_attention_kernel(%arg0: i32, %arg1: i32, %arg2: memref<2x8x32xf32, #tpu.memory_space<vmem>>, %arg3: memref<3x32x32xbf16, #tpu.memory_space<vmem>>, %arg4: memref<2x8x32xf32, #tpu.memory_space<vmem>>, %arg5: memref<2x8x8xf32, #tpu.memory_space<vmem>>, %arg6: memref<2x8x32xbf16, #tpu.memory_space<vmem>>, %arg7: memref<2x8x32xbf16, #tpu.memory_space<vmem>>, %arg8: memref<2x8x32xbf16, #tpu.memory_space<vmem>>) attributes {dimension_semantics = [#tpu.dimension_semantics<parallel>, #tpu.dimension_semantics<arbitrary>], iteration_bounds = array<i64: 1, 1>, scalar_prefetch = 0 : i64, scratch_operands = 3 : i64, tpu.core_type = #tpu.core_type<tc>, window_params = [{transform_indices = @transform_0, window_bounds = array<i64: 2, 8, 32>}, {pipeline_mode = #tpu.pipeline_mode<synchronous>, transform_indices = @transform_1, window_bounds = array<i64: 3, 32, 32>}, {transform_indices = @transform_2, window_bounds = array<i64: 2, 8, 32>}, {transform_indices = @transform_3, window_bounds = array<i64: 2, 8, 8>}]} {
    %c0_i32 = arith.constant 0 : i32
    %0 = arith.cmpi eq, %arg1, %c0_i32 : i32
    %1 = arith.extui %0 : i1 to i32
    %c0_i32_0 = arith.constant 0 : i32
    %2 = arith.cmpi ne, %1, %c0_i32_0 : i32
    scf.if %2 {
      %c0_17 = arith.constant 0 : index
      %c0_18 = arith.constant 0 : index
      %c0_19 = arith.constant 0 : index
      %24 = vector.load %arg2[%c0_17, %c0_18, %c0_19] : memref<2x8x32xf32, #tpu.memory_space<vmem>>, vector<2x8x32xf32>
      %25 = vector.shape_cast %24 : vector<2x8x32xf32> to vector<16x32xf32>
      %26 = arith.truncf %25 : vector<16x32xf32> to vector<16x32xbf16>
      %c0_20 = arith.constant 0 : index
      %c0_21 = arith.constant 0 : index
      %c0_22 = arith.constant 0 : index
      %27 = vector.load %arg3[%c0_20, %c0_21, %c0_22] : memref<3x32x32xbf16, #tpu.memory_space<vmem>>, vector<1x32x32xbf16>
      %28 = vector.shape_cast %27 : vector<1x32x32xbf16> to vector<32x32xbf16>
      %cst_23 = arith.constant dense<0.000000e+00> : vector<16x32xf32>
      %29 = tpu.matmul %26, %28, %cst_23 {dimension_numbers = #tpu.dot_dimension_numbers<[1], [0], [0], [1], [0, 0, 1, 1], [], []>} : vector<16x32xbf16>, vector<32x32xbf16>, vector<16x32xf32> -> vector<16x32xf32>
      %c1 = arith.constant 1 : index
      %c0_24 = arith.constant 0 : index
      %c0_25 = arith.constant 0 : index
      %30 = vector.load %arg3[%c1, %c0_24, %c0_25] : memref<3x32x32xbf16, #tpu.memory_space<vmem>>, vector<1x32x32xbf16>
      %31 = vector.shape_cast %30 : vector<1x32x32xbf16> to vector<32x32xbf16>
      %cst_26 = arith.constant dense<0.000000e+00> : vector<16x32xf32>
      %32 = tpu.matmul %26, %31, %cst_26 {dimension_numbers = #tpu.dot_dimension_numbers<[1], [0], [0], [1], [0, 0, 1, 1], [], []>} : vector<16x32xbf16>, vector<32x32xbf16>, vector<16x32xf32> -> vector<16x32xf32>
      %c2 = arith.constant 2 : index
      %c0_27 = arith.constant 0 : index
      %c0_28 = arith.constant 0 : index
      %33 = vector.load %arg3[%c2, %c0_27, %c0_28] : memref<3x32x32xbf16, #tpu.memory_space<vmem>>, vector<1x32x32xbf16>
      %34 = vector.shape_cast %33 : vector<1x32x32xbf16> to vector<32x32xbf16>
      %cst_29 = arith.constant dense<0.000000e+00> : vector<16x32xf32>
      %35 = tpu.matmul %26, %34, %cst_29 {dimension_numbers = #tpu.dot_dimension_numbers<[1], [0], [0], [1], [0, 0, 1, 1], [], []>} : vector<16x32xbf16>, vector<32x32xbf16>, vector<16x32xf32> -> vector<16x32xf32>
      %36 = arith.truncf %29 : vector<16x32xf32> to vector<16x32xbf16>
      %37 = math.tanh %36 : vector<16x32xbf16>
      %cst_30 = arith.constant 1.767580e-01 : bf16
      %38 = vector.broadcast %cst_30 : bf16 to vector<16x32xbf16>
      %39 = arith.mulf %37, %38 : vector<16x32xbf16>
      %40 = arith.truncf %32 : vector<16x32xf32> to vector<16x32xbf16>
      %41 = math.tanh %40 : vector<16x32xbf16>
      %42 = arith.truncf %35 : vector<16x32xf32> to vector<16x32xbf16>
      %43 = math.tanh %42 : vector<16x32xbf16>
      %44 = vector.shape_cast %39 : vector<16x32xbf16> to vector<2x8x32xbf16>
      %c0_31 = arith.constant 0 : index
      %c0_32 = arith.constant 0 : index
      %c0_33 = arith.constant 0 : index
      %45 = vector.load %arg6[%c0_31, %c0_32, %c0_33] : memref<2x8x32xbf16, #tpu.memory_space<vmem>>, vector<2x8x32xbf16>
      tpu.vector_store %arg6[%c0_31, %c0_32, %c0_33], %44 {strides = array<i32>} : memref<2x8x32xbf16, #tpu.memory_space<vmem>>, vector<2x8x32xbf16>,
      %46 = vector.shape_cast %41 : vector<16x32xbf16> to vector<2x8x32xbf16>
      %c0_34 = arith.constant 0 : index
      %c0_35 = arith.constant 0 : index
      %c0_36 = arith.constant 0 : index
      %47 = vector.load %arg7[%c0_34, %c0_35, %c0_36] : memref<2x8x32xbf16, #tpu.memory_space<vmem>>, vector<2x8x32xbf16>
      tpu.vector_store %arg7[%c0_34, %c0_35, %c0_36], %46 {strides = array<i32>} : memref<2x8x32xbf16, #tpu.memory_space<vmem>>, vector<2x8x32xbf16>,
      %48 = vector.shape_cast %43 : vector<16x32xbf16> to vector<2x8x32xbf16>
      %c0_37 = arith.constant 0 : index
      %c0_38 = arith.constant 0 : index
      %c0_39 = arith.constant 0 : index
      %49 = vector.load %arg8[%c0_37, %c0_38, %c0_39] : memref<2x8x32xbf16, #tpu.memory_space<vmem>>, vector<2x8x32xbf16>
      tpu.vector_store %arg8[%c0_37, %c0_38, %c0_39], %48 {strides = array<i32>} : memref<2x8x32xbf16, #tpu.memory_space<vmem>>, vector<2x8x32xbf16>,
    } else {
    }
    %c8_i32 = arith.constant 8 : i32
    %3 = arith.muli %arg1, %c8_i32 : i32
    %4 = tpu.assume_multiple %3, 8 : i32
    %c0 = arith.constant 0 : index
    %5 = arith.index_cast %4 : i32 to index
    %c0_1 = arith.constant 0 : index
    %6 = vector.load %arg6[%c0, %5, %c0_1] : memref<2x8x32xbf16, #tpu.memory_space<vmem>>, vector<2x8x32xbf16>
    %c0_2 = arith.constant 0 : index
    %c0_3 = arith.constant 0 : index
    %c0_4 = arith.constant 0 : index
    %7 = vector.load %arg7[%c0_2, %c0_3, %c0_4] : memref<2x8x32xbf16, #tpu.memory_space<vmem>>, vector<2x8x32xbf16>
    %c0_5 = arith.constant 0 : index
    %c0_6 = arith.constant 0 : index
    %c0_7 = arith.constant 0 : index
    %8 = vector.load %arg8[%c0_5, %c0_6, %c0_7] : memref<2x8x32xbf16, #tpu.memory_space<vmem>>, vector<2x8x32xbf16>
    "tpu.trace_start"() <{level = 10 : i32, message = "bqd,bkd->bqk"}> : () -> ()
    %cst = arith.constant dense<0.000000e+00> : vector<2x8x8xf32>
    %9 = tpu.matmul %6, %7, %cst {dimension_numbers = #tpu.dot_dimension_numbers<[2], [2], [1], [1], [0, 0, 0, 1, 1, 1], [0], [0]>} : vector<2x8x32xbf16>, vector<2x8x32xbf16>, vector<2x8x8xf32> -> vector<2x8x8xf32>
    "tpu.trace_stop"() : () -> ()
    %cst_8 = arith.constant dense<0xFF800000> : vector<2x8xf32>
    %10 = vector.multi_reduction <maximumf>, %9, %cst_8 [2] : vector<2x8x8xf32> to vector<2x8xf32>
    %11 = vector.shape_cast %10 : vector<2x8xf32> to vector<2x8x1xf32>
    %12 = vector.broadcast %11 : vector<2x8x1xf32> to vector<2x8x8xf32>
    %13 = arith.subf %9, %12 : vector<2x8x8xf32>
    %14 = math.exp %13 : vector<2x8x8xf32>
    %cst_9 = arith.constant dense<0.000000e+00> : vector<2x8xf32>
    %15 = vector.multi_reduction <add>, %14, %cst_9 [2] : vector<2x8x8xf32> to vector<2x8xf32>
    %16 = vector.shape_cast %15 : vector<2x8xf32> to vector<2x8x1xf32>
    %17 = tpu.reciprocal %16 {approx = true} : vector<2x8x1xf32> -> vector<2x8x1xf32>
    %18 = vector.broadcast %17 : vector<2x8x1xf32> to vector<2x8x8xf32>
    %19 = arith.mulf %14, %18 : vector<2x8x8xf32>
    %20 = arith.truncf %19 : vector<2x8x8xf32> to vector<2x8x8xbf16>
    "tpu.trace_start"() <{level = 10 : i32, message = "bqk,bkd->bqd"}> : () -> ()
    %cst_10 = arith.constant dense<0.000000e+00> : vector<2x8x32xf32>
    %21 = tpu.matmul %20, %8, %cst_10 {dimension_numbers = #tpu.dot_dimension_numbers<[2], [1], [1], [2], [0, 0, 0, 1, 1, 2], [0], [0]>} : vector<2x8x8xbf16>, vector<2x8x32xbf16>, vector<2x8x32xf32> -> vector<2x8x32xf32>
    "tpu.trace_stop"() : () -> ()
    %c0_11 = arith.constant 0 : index
    %c0_12 = arith.constant 0 : index
    %c0_13 = arith.constant 0 : index
    %22 = vector.load %arg4[%c0_11, %c0_12, %c0_13] : memref<2x8x32xf32, #tpu.memory_space<vmem>>, vector<2x8x32xf32>
    tpu.vector_store %arg4[%c0_11, %c0_12, %c0_13], %21 {strides = array<i32>} : memref<2x8x32xf32, #tpu.memory_space<vmem>>, vector<2x8x32xf32>,
    %c0_14 = arith.constant 0 : index
    %c0_15 = arith.constant 0 : index
    %c0_16 = arith.constant 0 : index
    %23 = vector.load %arg5[%c0_14, %c0_15, %c0_16] : memref<2x8x8xf32, #tpu.memory_space<vmem>>, vector<2x8x8xf32>
    tpu.vector_store %arg5[%c0_14, %c0_15, %c0_16], %19 {strides = array<i32>} : memref<2x8x8xf32, #tpu.memory_space<vmem>>, vector<2x8x8xf32>,
    return
  }
  func.func @transform_0(%arg0: i32, %arg1: i32) -> (i32, i32, i32) {
    %c0_i32 = arith.constant 0 : i32
    %c0_i32_0 = arith.constant 0 : i32
    %c0_i32_1 = arith.constant 0 : i32
    return %arg0, %c0_i32, %c0_i32_0 : i32, i32, i32
  }
  func.func @transform_1(%arg0: i32, %arg1: i32) -> (i32, i32, i32) {
    %c0_i32 = arith.constant 0 : i32
    %c0_i32_0 = arith.constant 0 : i32
    %c0_i32_1 = arith.constant 0 : i32
    %c0_i32_2 = arith.constant 0 : i32
    return %c0_i32, %c0_i32_0, %c0_i32_1 : i32, i32, i32
  }
  func.func @transform_2(%arg0: i32, %arg1: i32) -> (i32, i32, i32) {
    %c0_i32 = arith.constant 0 : i32
    %c0_i32_0 = arith.constant 0 : i32
    return %arg0, %arg1, %c0_i32 : i32, i32, i32
  }
  func.func @transform_3(%arg0: i32, %arg1: i32) -> (i32, i32, i32) {
    %c0_i32 = arith.constant 0 : i32
    %c0_i32_0 = arith.constant 0 : i32
    return %arg0, %arg1, %c0_i32 : i32, i32, i32
  }
}

</mosaic_0001>

<bundles_post_ra>
// kernel: tpu_custom_call.1
= control target key start
LH: loop header
LB: loop body
LE: loop exit
PB: predicated region body
PF: predicated region fallthrough
CT: control target
= control target key end

     0   :  { %9 = vsyncpa [#allocation6], 0  ;;  %s870_s0 = inlined_call_operand.hbm [shape: f32[2,8,32], index: 0, kind: input, shape index: {}]   ;;  %s871_s1 = inlined_call_operand.hbm [shape: bf16[3,32,32], index: 1, kind: input, shape index: {}]   ;;  %s872_s2 = inlined_call_operand.hbm [shape: f32[2,8,32], index: 2, kind: output, shape index: {0}]   ;;  %s873_s3 = inlined_call_operand.hbm [shape: f32[2,8,8], index: 3, kind: output, shape index: {1}]  }
   0x1   :  { %10 = vsyncpa [#allocation9], 0 }
   0x2   :  { %11 = vsyncpa [#allocation7], 0 }
   0x3   :  { %12 = vsyncpa [#allocation12], 0  ;;  %s736_s12 = smov [#allocation5]   ;;  %s640_s16 = scalar_lea.hbm %s870_s0, 256 }
   0x4   :  { %s18_s13 = sshll.u32 %s736_s12, 4  ;;  %p641_p0 = scmp.ne.s32.totalorder %s870_s0, %s640_s16  ;;  %s19_s13 = int_to_ptr.vmem [resolvable:$true] %s18_s13 }
   0x5   :  { %p644_p1 = scmp.lt.u32.totalorder %s640_s16, %s870_s0 }
   0x7   :  { %p646_p2 = pnand %p644_p1, %p641_p0 }
   0x9   :  { %649 = shalt.err (!%p646_p2)
}
   0xa   :  { %s650_s21 = scalar_lea.vmem %s19_s13, 256  ;;  %p655_p4 = scmp.lt.s32.totalorder %s19_s13, %s19_s13 }
   0xb   :  { %p651_p3 = scmp.ne.s32.totalorder %s19_s13, %s650_s21  ;;  %p656_p5 = scmp.lt.s32.totalorder %s650_s21, %s650_s21 }
   0xd   :  { %p657_p6 = por %p656_p5, %p655_p4 }
   0xf   :  { %p658_p7 = pnand %p657_p6, %p651_p3 }
  0x11   :  { %661 = shalt.err (!%p658_p7)
}
  0x12   :  { %s737_s22 = smov 128   ;;  %s738_s23 = smov 8  }
  0x13   :  { %24 = dma.hbm_to_vmem [thread:$0]  %s870_s0, 256, %s19_s13, [#allocation6], %s737_s22, %s737_s22, %s738_s23  }
  0x14   :  { %s739_s26 = smov [#allocation8]   ;;  %s662_s30 = scalar_lea.hbm %s871_s1, 768 }
  0x15   :  { %s30_s27 = sshll.u32 %s739_s26, 4  ;;  %p663_p8 = scmp.ne.s32.totalorder %s871_s1, %s662_s30  ;;  %s31_s27 = int_to_ptr.vmem [resolvable:$true] %s30_s27 }
  0x16   :  { %p666_p9 = scmp.lt.u32.totalorder %s662_s30, %s871_s1 }
  0x18   :  { %p668_p10 = pnand %p666_p9, %p663_p8 }
  0x1a   :  { %671 = shalt.err (!%p668_p10)
}
  0x1b   :  { %s672_s8 = scalar_lea.vmem %s31_s27, 768  ;;  %p677_p12 = scmp.lt.s32.totalorder %s31_s27, %s31_s27 }
  0x1c   :  { %p673_p11 = scmp.ne.s32.totalorder %s31_s27, %s672_s8  ;;  %p678_p13 = scmp.lt.s32.totalorder %s672_s8, %s672_s8 }
  0x1e   :  { %p679_p0 = por %p678_p13, %p677_p12 }
  0x20   :  { %p680_p1 = pnand %p679_p0, %p673_p11 }
  0x22   :  { %683 = shalt.err (!%p680_p1)
}
  0x23   :  { %s740_s0 = smov 64   ;;  %s741_s9 = smov 4  }
  0x24   :  { %36 = dma.hbm_to_vmem [thread:$0]  %s871_s1, 768, %s31_s27, [#allocation9], %s740_s0, %s740_s0, %s741_s9  }
  0x25   :  { %728 = dma.done.wait [#allocation6], 256  }
  0x26   :  { %729 = vsyncadd [#allocation6], 4294967040 }
  0x27   :  { %730 = dma.done.wait [#allocation9], 768  }
  0x28   :  { %731 = vsyncadd [#allocation9], 4294966528  ;;  %v742_v0 = vmov 0.0   ;;  %vm743_vm0 = vmmov 0   ;;  %v620_v1 = vld [vmem:[#allocation8 + $0x10] sm:$0xff]   ;;  %v621_v2 = vld [vmem:[#allocation8] sm:$0xff]  }
  0x29   :  { %570 = vmatprep.subr.bf16.mxu1 %v742_v0  ;;  %562 = vmatprep.subr.bf16.mxu0 %v742_v0  ;;  %v622_v3 = vld [vmem:[#allocation8 + $0x18] sm:$0xff]   ;;  %v49_v4 = vld [vmem:[#allocation5] sm:$0xff]  ;;  %v623_v6 = vld [vmem:[#allocation8 + $0x8] sm:$0xff]   ;;  %vm68_vm1 = vcmask 261120   ;;  %vm243_vm2 = vcmask 257024   ;;  %vm396_vm3 = vcmask 1043456  }
  0x2a   :  { %574 = vmatprep.mubr.msk.bf16.mxu1 %vm743_vm0, %v742_v0  ;;  %566 = vmatprep.mubr.msk.bf16.mxu0 %vm743_vm0, %v742_v0  ;;  %v50_v5 = vld [vmem:[#allocation5 + $0x8] sm:$0xff]  ;;  %v624_v8 = vld [vmem:[#allocation8 + $0x20] sm:$0xff]   ;;  %v625_v9 = vld [vmem:[#allocation8 + $0x28] sm:$0xff]   ;;  %vm368_vm4 = vcmask 64512   ;;  %s744_s1 = smov [#allocation11]  }
  0x2b   :  { %571 = vmatpush3.bf16.msra.mxu1 %v620_v1  ;;  %563 = vmatpush3.bf16.msra.mxu0 %v621_v2  ;;  %v51_v7 = vpack.c.bf16 %v50_v5, %v49_v4  ;;  %s507_s12 = sshll.u32 %s744_s1, 4  ;;  %s508_s12 = int_to_ptr.vmem [resolvable:$true] %s507_s12 }
  0x2c   :  { %572 = vmatprep.subr.bf16.mxu1 %v742_v0  ;;  %564 = vmatprep.subr.bf16.mxu0 %v742_v0  ;;  %s684_s13 = scalar_lea.vmem %s508_s12, 256  ;;  %p689_p3 = scmp.lt.s32.totalorder %s508_s12, %s508_s12 }
  0x2d   :  { %p685_p2 = scmp.ne.s32.totalorder %s508_s12, %s684_s13  ;;  %p690_p4 = scmp.lt.s32.totalorder %s684_s13, %s684_s13 }
  0x2f   :  { %573 = vmatpush3.bf16.msra.mxu1 %v622_v3  ;;  %565 = vmatpush3.bf16.msra.mxu0 %v623_v6  ;;  %p691_p5 = por %p690_p4, %p689_p3 }
  0x30   :  { %586 = vmatprep.subr.bf16.mxu1 %v742_v0  ;;  %578 = vmatprep.subr.bf16.mxu0 %v742_v0 }
  0x31   :  { %p692_p6 = pnand %p691_p5, %p685_p2 }
  0x32   :  { %575 = vmatmul.mubr.msk.bf16.vlgmr.msra.gmra.mrb[0].mxu1 %vm68_vm1, %v51_v7  ;;  %567 = vmatmul.mubr.msk.bf16.vlgmr.msra.gmra.mrb[0].mxu0 %vm68_vm1, %v51_v7 }
  0x33   :  { %588 = vmatprep.mubr.msk.bf16.mxu1 %vm743_vm0, %v742_v0  ;;  %582 = vmatprep.mubr.msk.bf16.mxu0 %vm743_vm0, %v742_v0 }
  0x34   :  { %579 = vmatpush3.bf16.msra.mxu0 %v624_v8 }
  0x35   :  { %580 = vmatprep.subr.bf16.mxu0 %v742_v0 }
  0x38   :  { %581 = vmatpush3.bf16.msra.mxu0 %v625_v9 }
  0x39   :  { %592 = vmatprep.subr.bf16.mxu0 %v742_v0 }
  0x3b   :  { %583 = vmatmul.mubr.msk.bf16.vlgmr.msra.gmra.mrb[4].mxu0 %vm68_vm1, %v51_v7 }
  0x3c   :  { %594 = vmatprep.mubr.msk.bf16.mxu0 %vm743_vm0, %v742_v0 }
 0x105   :  { %v164_v10 = vpop.f32.mrb[0].mxu1  ;;  %v106_v12 = vpop.f32.mrb[0].mxu0 }
 0x106   :  { %v576_v11 = vpop.f32.mrb[1].mxu1  ;;  %v568_v14 = vpop.f32.mrb[1].mxu0 }
 0x107   :  { %v167_v13 = vpop.f32.mrb[2].mxu1  ;;  %v109_v17 = vpop.f32.mrb[2].mxu0 }
 0x108   :  { %v232_v15 = vpack.c.bf16 %v167_v13, %v164_v10  ;;  %v577_v16 = vpop.f32.mrb[3].mxu1  ;;  %v229_v18 = vpack.c.bf16 %v109_v17, %v106_v12  ;;  %v569_v19 = vpop.f32.mrb[3].mxu0 }
 0x10a   :  { %626 = vtanh.bf16 %v232_v15 }
 0x10b   :  { %628 = vtanh.bf16 %v229_v18 }
 0x10e   :  { %v222_v33 = vpop.f32.mrb[4].mxu0 }
 0x10f   :  { %v584_v34 = vpop.f32.mrb[5].mxu0 }
 0x110   :  { %v225_v35 = vpop.f32.mrb[6].mxu0 }
 0x111   :  { %v234_v36 = vpack.c.bf16 %v225_v35, %v222_v33  ;;  %v585_v37 = vpop.f32.mrb[7].mxu0 }
 0x113   :  { %630 = vtanh.bf16 %v234_v36 }
 0x115   :  { %v627_v20 = vpop.eup %626 }
 0x116   :  { %v629_v21 = vpop.eup %628  ;;  %v537_v22 = vcombine.low %v627_v20, %v627_v20  ;;  %v538_v23 = vcombine.high %v627_v20, %v627_v20 }
 0x117   :  { %v231_v24 = vmul.bf16 1043676725, %v629_v21 }
 0x118   :  { %253 = vst.msk [vmem:[#allocation3] sm:$0xf] %vm243_vm2, %v537_v22  ;;  %254 = vst.msk [vmem:[#allocation3 + $0x4] sm:$0xf] %vm243_vm2, %v538_v23 }
 0x119   :  { %v535_v25 = vcombine.low %v231_v24, %v231_v24  ;;  %v536_v26 = vcombine.high %v231_v24, %v231_v24 }
 0x11b   :  { %244 = vst.msk [vmem:[#allocation2] sm:$0xf] %vm243_vm2, %v535_v25  ;;  %245 = vst.msk [vmem:[#allocation2 + $0x4] sm:$0xf] %vm243_vm2, %v536_v26 }
 0x11e   :  { %v631_v38 = vpop.eup %630 }
 0x11f   :  { %v271_v27 = vld [vmem:[#allocation3] sm:$0xf]  ;;  %v272_v28 = vld [vmem:[#allocation3 + $0x4] sm:$0xf]  ;;  %v539_v39 = vcombine.low %v631_v38, %v631_v38  ;;  %v540_v40 = vcombine.high %v631_v38, %v631_v38 }
 0x120   :  { %v280_v29 = vsel %vm68_vm1, %v271_v27, 0  ;;  %v326_v30 = vsel %vm68_vm1, %v272_v28, 0 }
 0x121   :  { %587 = vmatpush3.bf16.xpose.msra.mxu1 %v280_v29  ;;  %593 = vmatpush3.bf16.xpose.msra.mxu0 %v326_v30  ;;  %262 = vst.msk [vmem:[#allocation4] sm:$0xf] %vm243_vm2, %v539_v39  ;;  %263 = vst.msk [vmem:[#allocation4 + $0x4] sm:$0xf] %vm243_vm2, %v540_v40 }
 0x122   :  { %598 = vmatprep.subr.bf16.mxu1 %v742_v0  ;;  %604 = vmatprep.subr.bf16.mxu0 %v742_v0  ;;  %v269_v31 = vld [vmem:[#allocation2] sm:$0xf]  ;;  %v270_v32 = vld [vmem:[#allocation2 + $0x4] sm:$0xf] }
 0x128   :  { %589 = vmatmul.mubr.msk.bf16.vlgmr.msra.gmra.mrb[4].mxu1 %vm68_vm1, %v269_v31  ;;  %595 = vmatmul.mubr.msk.bf16.vlgmr.msra.gmra.mrb[8].mxu0 %vm68_vm1, %v270_v32  ;;  %v273_v41 = vld [vmem:[#allocation4] sm:$0xf]  ;;  %v274_v42 = vld [vmem:[#allocation4 + $0x4] sm:$0xf] }
 0x129   :  { %600 = vmatprep.mubr.msk.bf16.mxu1 %vm743_vm0, %v742_v0  ;;  %606 = vmatprep.mubr.msk.bf16.mxu0 %vm743_vm0, %v742_v0  ;;  %v398_v43 = vsel %vm396_vm3, %v273_v41, 0  ;;  %v444_v44 = vsel %vm396_vm3, %v274_v42, 0 }
 0x12a   :  { %599 = vmatpush3.bf16.msra.mxu1 %v398_v43  ;;  %605 = vmatpush3.bf16.msra.mxu0 %v444_v44 }
 0x1fb   :  { %v316_v45 = vpop.f32.mrb[4].mxu1  ;;  %v362_v46 = vpop.f32.mrb[8].mxu0 }
 0x1fc   :  { %v590_v47 = vpop.f32.mrb[5].mxu1  ;;  %v596_v48 = vpop.f32.mrb[9].mxu0  ;;  %v369_v49 = vsel %vm368_vm4, %v316_v45, -inf  ;;  %v372_v54 = vsel %vm368_vm4, %v362_v46, -inf }
 0x1fd   :  { %370 = vmax.xlane.f32.xlu0 %v369_v49  ;;  %v319_v50 = vpop.f32.mrb[6].mxu1  ;;  %v365_v51 = vpop.f32.mrb[10].mxu0 }
 0x1fe   :  { %v591_v52 = vpop.f32.mrb[7].mxu1  ;;  %v597_v53 = vpop.f32.mrb[11].mxu0 }
 0x201   :  { %373 = vmax.xlane.f32.xlu0 %v372_v54 }
 0x28a   :  { %v371_v55 = vpop.xlane.xlu0 %370 }
 0x28b   :  { %v375_v56 = vsub.f32 %v316_v45, %v371_v55 }
 0x28d   :  { %v377_v57 = vmul.f32 1.442695, %v375_v56 }
 0x28e   :  { %v374_v58 = vpop.xlane.xlu0 %373 }
 0x28f   :  { %632 = vpow2.f32 %v377_v57  ;;  %v376_v59 = vsub.f32 %v362_v46, %v374_v58 }
 0x291   :  { %v379_v60 = vmul.f32 1.442695, %v376_v59 }
 0x293   :  { %634 = vpow2.f32 %v379_v60 }
 0x299   :  { %v633_v61 = vpop.eup %632 }
 0x29a   :  { %v381_v62 = vsel %vm368_vm4, %v633_v61, 0.0 }
 0x29b   :  { %382 = vadd.xlane.f32.xlu1 %v381_v62 }
 0x29d   :  { %v635_v63 = vpop.eup %634 }
 0x29e   :  { %v384_v0 = vsel %vm368_vm4, %v635_v63, 0.0 }
 0x29f   :  { %385 = vadd.xlane.f32.xlu1 %v384_v0 }
 0x328   :  { %v383_v1 = vpop.xlane.xlu1 %382 }
 0x329   :  { %636 = vrcp.f32 %v383_v1 }
 0x32c   :  { %v386_v2 = vpop.xlane.xlu1 %385 }
 0x32d   :  { %638 = vrcp.f32 %v386_v2 }
 0x333   :  { %v637_v3 = vpop.eup %636 }
 0x334   :  { %v389_v4 = vmul.f32 %v637_v3, %v633_v61 }
 0x336   :  { %488 = vst.msk [vmem:[#allocation11] sm:$0xff] %vm368_vm4, %v389_v4  ;;  %v391_v5 = vpack.c.bf16 %v389_v4, %v389_v4 }
 0x337   :  { %v639_v6 = vpop.eup %638 }
 0x338   :  { %v390_v7 = vmul.f32 %v639_v6, %v635_v63  ;;  %601 = vmatmul.mubr.msk.bf16.vlgmr.msra.gmra.mrb[8].mxu1 %vm368_vm4, %v391_v5 }
 0x33a   :  { %489 = vst.msk [vmem:[#allocation11 + $0x8] sm:$0xff] %vm368_vm4, %v390_v7  ;;  %v392_v8 = vpack.c.bf16 %v390_v7, %v390_v7 }
 0x33c   :  { %607 = vmatmul.mubr.msk.bf16.vlgmr.msra.gmra.mrb[12].mxu0 %vm368_vm4, %v392_v8 }
 0x33d   :  { %695 = shalt.err (!%p692_p6)
}
 0x33e   :  { %s696_s16 = scalar_lea.hbm %s873_s3, 256 }
 0x33f   :  { %p697_p7 = scmp.ne.s32.totalorder %s873_s3, %s696_s16  ;;  %p700_p8 = scmp.lt.u32.totalorder %s696_s16, %s873_s3 }
 0x341   :  { %p702_p9 = pnand %p700_p8, %p697_p7 }
 0x343   :  { %705 = shalt.err (!%p702_p9)
}
 0x344   :  { %513 = dma.vmem_to_hbm [thread:$0]  %s508_s12, 256, %s873_s3, [#allocation12], %s737_s22, %s737_s22, %s738_s23  }
 0x345   :  { %s745_s25 = smov [#allocation10]  }
 0x346   :  { %s495_s26 = sshll.u32 %s745_s25, 4  ;;  %s496_s26 = int_to_ptr.vmem [resolvable:$true] %s495_s26 }
 0x347   :  { %s706_s27 = scalar_lea.vmem %s496_s26, 256  ;;  %p711_p11 = scmp.lt.s32.totalorder %s496_s26, %s496_s26 }
 0x348   :  { %p707_p10 = scmp.ne.s32.totalorder %s496_s26, %s706_s27  ;;  %p712_p12 = scmp.lt.s32.totalorder %s706_s27, %s706_s27 }
 0x34a   :  { %p713_p13 = por %p712_p12, %p711_p11 }
 0x34c   :  { %p714_p0 = pnand %p713_p13, %p707_p10 }
 0x40b   :  { %v434_v9 = vpop.f32.mrb[8].mxu1 }
 0x40c   :  { %486 = vst.msk [vmem:[#allocation10] sm:$0xff] %vm68_vm1, %v434_v9  ;;  %v602_v10 = vpop.f32.mrb[9].mxu1 }
 0x40d   :  { %v437_v11 = vpop.f32.mrb[10].mxu1 }
 0x40e   :  { %v603_v12 = vpop.f32.mrb[11].mxu1 }
 0x40f   :  { %v480_v13 = vpop.f32.mrb[12].mxu0 }
 0x410   :  { %487 = vst.msk [vmem:[#allocation10 + $0x8] sm:$0xff] %vm68_vm1, %v480_v13  ;;  %v608_v14 = vpop.f32.mrb[13].mxu0 }
 0x411   :  { %v483_v15 = vpop.f32.mrb[14].mxu0 }
 0x412   :  { %717 = shalt.err (!%p714_p0)
}
 0x413   :  { %s718_s29 = scalar_lea.hbm %s872_s2, 256 }
 0x414   :  { %p719_p1 = scmp.ne.s32.totalorder %s872_s2, %s718_s29  ;;  %p722_p2 = scmp.lt.u32.totalorder %s718_s29, %s872_s2 }
 0x416   :  { %p724_p3 = pnand %p722_p2, %p719_p1 }
 0x418   :  { %727 = shalt.err (!%p724_p3)
}
 0x419   :  { %501 = dma.vmem_to_hbm [thread:$0]  %s496_s26, 256, %s872_s2, [#allocation7], %s737_s22, %s737_s22, %s738_s23   ;;  %v609_v16 = vpop.f32.mrb[15].mxu0 }
 0x41a   :  { %732 = dma.done.wait [#allocation7], 256  }
 0x41b   :  { %733 = vsyncadd [#allocation7], 4294967040 }
 0x41c   :  { %734 = dma.done.wait [#allocation12], 256  }
 0x41d   :  { %735 = vsyncadd [#allocation12], 4294967040 }
 0x41e   :  { %520 = vsyncpa [#allocation6], 1 }
 0x41f   :  { %521 = vsyncpa [#allocation9], 1 }
 0x420   :  { %522 = vsyncpa [#allocation7], 1 }
 0x421   :  { %523 = vsyncpa [#allocation12], 1 }

// kernel: tpu_custom_call.1
= control target key start
LH: loop header
LB: loop body
LE: loop exit
PB: predicated region body
PF: predicated region fallthrough
CT: control target
= control target key end

     0   :  { %9 = vsyncpa [#allocation6], 0  ;;  %s870_s0 = inlined_call_operand.hbm [shape: f32[2,8,32], index: 0, kind: input, shape index: {}]   ;;  %s871_s1 = inlined_call_operand.hbm [shape: bf16[3,32,32], index: 1, kind: input, shape index: {}]   ;;  %s872_s2 = inlined_call_operand.hbm [shape: f32[2,8,32], index: 2, kind: output, shape index: {0}]   ;;  %s873_s3 = inlined_call_operand.hbm [shape: f32[2,8,8], index: 3, kind: output, shape index: {1}]  }
   0x1   :  { %10 = vsyncpa [#allocation9], 0 }
   0x2   :  { %11 = vsyncpa [#allocation7], 0 }
   0x3   :  { %12 = vsyncpa [#allocation12], 0  ;;  %s736_s12 = smov [#allocation5]   ;;  %s640_s16 = scalar_lea.hbm %s870_s0, 256 }
   0x4   :  { %s18_s13 = sshll.u32 %s736_s12, 4  ;;  %p641_p0 = scmp.ne.s32.totalorder %s870_s0, %s640_s16  ;;  %s19_s13 = int_to_ptr.vmem [resolvable:$true] %s18_s13 }
   0x5   :  { %p644_p1 = scmp.lt.u32.totalorder %s640_s16, %s870_s0 }
   0x7   :  { %p646_p2 = pnand %p644_p1, %p641_p0 }
   0x9   :  { %649 = shalt.err (!%p646_p2)
}
   0xa   :  { %s650_s21 = scalar_lea.vmem %s19_s13, 256  ;;  %p655_p4 = scmp.lt.s32.totalorder %s19_s13, %s19_s13 }
   0xb   :  { %p651_p3 = scmp.ne.s32.totalorder %s19_s13, %s650_s21  ;;  %p656_p5 = scmp.lt.s32.totalorder %s650_s21, %s650_s21 }
   0xd   :  { %p657_p6 = por %p656_p5, %p655_p4 }
   0xf   :  { %p658_p7 = pnand %p657_p6, %p651_p3 }
  0x11   :  { %661 = shalt.err (!%p658_p7)
}
  0x12   :  { %s737_s22 = smov 128   ;;  %s738_s23 = smov 8  }
  0x13   :  { %24 = dma.hbm_to_vmem [thread:$0]  %s870_s0, 256, %s19_s13, [#allocation6], %s737_s22, %s737_s22, %s738_s23  }
  0x14   :  { %s739_s26 = smov [#allocation8]   ;;  %s662_s30 = scalar_lea.hbm %s871_s1, 768 }
  0x15   :  { %s30_s27 = sshll.u32 %s739_s26, 4  ;;  %p663_p8 = scmp.ne.s32.totalorder %s871_s1, %s662_s30  ;;  %s31_s27 = int_to_ptr.vmem [resolvable:$true] %s30_s27 }
  0x16   :  { %p666_p9 = scmp.lt.u32.totalorder %s662_s30, %s871_s1 }
  0x18   :  { %p668_p10 = pnand %p666_p9, %p663_p8 }
  0x1a   :  { %671 = shalt.err (!%p668_p10)
}
  0x1b   :  { %s672_s8 = scalar_lea.vmem %s31_s27, 768  ;;  %p677_p12 = scmp.lt.s32.totalorder %s31_s27, %s31_s27 }
  0x1c   :  { %p673_p11 = scmp.ne.s32.totalorder %s31_s27, %s672_s8  ;;  %p678_p13 = scmp.lt.s32.totalorder %s672_s8, %s672_s8 }
  0x1e   :  { %p679_p0 = por %p678_p13, %p677_p12 }
  0x20   :  { %p680_p1 = pnand %p679_p0, %p673_p11 }
  0x22   :  { %683 = shalt.err (!%p680_p1)
}
  0x23   :  { %s740_s0 = smov 64   ;;  %s741_s9 = smov 4  }
  0x24   :  { %36 = dma.hbm_to_vmem [thread:$0]  %s871_s1, 768, %s31_s27, [#allocation9], %s740_s0, %s740_s0, %s741_s9  }
  0x25   :  { %728 = dma.done.wait [#allocation6], 256  }
  0x26   :  { %729 = vsyncadd [#allocation6], 4294967040 }
  0x27   :  { %730 = dma.done.wait [#allocation9], 768  }
  0x28   :  { %731 = vsyncadd [#allocation9], 4294966528  ;;  %v742_v0 = vmov 0.0   ;;  %vm743_vm0 = vmmov 0   ;;  %v620_v1 = vld [vmem:[#allocation8 + $0x10] sm:$0xff]   ;;  %v621_v2 = vld [vmem:[#allocation8] sm:$0xff]  }
  0x29   :  { %570 = vmatprep.subr.bf16.mxu1 %v742_v0  ;;  %562 = vmatprep.subr.bf16.mxu0 %v742_v0  ;;  %v622_v3 = vld [vmem:[#allocation8 + $0x18] sm:$0xff]   ;;  %v49_v4 = vld [vmem:[#allocation5] sm:$0xff]  ;;  %v623_v6 = vld [vmem:[#allocation8 + $0x8] sm:$0xff]   ;;  %vm68_vm1 = vcmask 261120   ;;  %vm243_vm2 = vcmask 257024   ;;  %vm396_vm3 = vcmask 1043456  }
  0x2a   :  { %574 = vmatprep.mubr.msk.bf16.mxu1 %vm743_vm0, %v742_v0  ;;  %566 = vmatprep.mubr.msk.bf16.mxu0 %vm743_vm0, %v742_v0  ;;  %v50_v5 = vld [vmem:[#allocation5 + $0x8] sm:$0xff]  ;;  %v624_v8 = vld [vmem:[#allocation8 + $0x20] sm:$0xff]   ;;  %v625_v9 = vld [vmem:[#allocation8 + $0x28] sm:$0xff]   ;;  %vm368_vm4 = vcmask 64512   ;;  %s744_s1 = smov [#allocation11]  }
  0x2b   :  { %571 = vmatpush3.bf16.msra.mxu1 %v620_v1  ;;  %563 = vmatpush3.bf16.msra.mxu0 %v621_v2  ;;  %v51_v7 = vpack.c.bf16 %v50_v5, %v49_v4  ;;  %s507_s12 = sshll.u32 %s744_s1, 4  ;;  %s508_s12 = int_to_ptr.vmem [resolvable:$true] %s507_s12 }
  0x2c   :  { %572 = vmatprep.subr.bf16.mxu1 %v742_v0  ;;  %564 = vmatprep.subr.bf16.mxu0 %v742_v0  ;;  %s684_s13 = scalar_lea.vmem %s508_s12, 256  ;;  %p689_p3 = scmp.lt.s32.totalorder %s508_s12, %s508_s12 }
  0x2d   :  { %p685_p2 = scmp.ne.s32.totalorder %s508_s12, %s684_s13  ;;  %p690_p4 = scmp.lt.s32.totalorder %s684_s13, %s684_s13 }
  0x2f   :  { %573 = vmatpush3.bf16.msra.mxu1 %v622_v3  ;;  %565 = vmatpush3.bf16.msra.mxu0 %v623_v6  ;;  %p691_p5 = por %p690_p4, %p689_p3 }
  0x30   :  { %586 = vmatprep.subr.bf16.mxu1 %v742_v0  ;;  %578 = vmatprep.subr.bf16.mxu0 %v742_v0 }
  0x31   :  { %p692_p6 = pnand %p691_p5, %p685_p2 }
  0x32   :  { %575 = vmatmul.mubr.msk.bf16.vlgmr.msra.gmra.mrb[0].mxu1 %vm68_vm1, %v51_v7  ;;  %567 = vmatmul.mubr.msk.bf16.vlgmr.msra.gmra.mrb[0].mxu0 %vm68_vm1, %v51_v7 }
  0x33   :  { %588 = vmatprep.mubr.msk.bf16.mxu1 %vm743_vm0, %v742_v0  ;;  %582 = vmatprep.mubr.msk.bf16.mxu0 %vm743_vm0, %v742_v0 }
  0x34   :  { %579 = vmatpush3.bf16.msra.mxu0 %v624_v8 }
  0x35   :  { %580 = vmatprep.subr.bf16.mxu0 %v742_v0 }
  0x38   :  { %581 = vmatpush3.bf16.msra.mxu0 %v625_v9 }
  0x39   :  { %592 = vmatprep.subr.bf16.mxu0 %v742_v0 }
  0x3b   :  { %583 = vmatmul.mubr.msk.bf16.vlgmr.msra.gmra.mrb[4].mxu0 %vm68_vm1, %v51_v7 }
  0x3c   :  { %594 = vmatprep.mubr.msk.bf16.mxu0 %vm743_vm0, %v742_v0 }
 0x105   :  { %v164_v10 = vpop.f32.mrb[0].mxu1  ;;  %v106_v12 = vpop.f32.mrb[0].mxu0 }
 0x106   :  { %v576_v11 = vpop.f32.mrb[1].mxu1  ;;  %v568_v14 = vpop.f32.mrb[1].mxu0 }
 0x107   :  { %v167_v13 = vpop.f32.mrb[2].mxu1  ;;  %v109_v17 = vpop.f32.mrb[2].mxu0 }
 0x108   :  { %v232_v15 = vpack.c.bf16 %v167_v13, %v164_v10  ;;  %v577_v16 = vpop.f32.mrb[3].mxu1  ;;  %v229_v18 = vpack.c.bf16 %v109_v17, %v106_v12  ;;  %v569_v19 = vpop.f32.mrb[3].mxu0 }
 0x10a   :  { %626 = vtanh.bf16 %v232_v15 }
 0x10b   :  { %628 = vtanh.bf16 %v229_v18 }
 0x10e   :  { %v222_v33 = vpop.f32.mrb[4].mxu0 }
 0x10f   :  { %v584_v34 = vpop.f32.mrb[5].mxu0 }
 0x110   :  { %v225_v35 = vpop.f32.mrb[6].mxu0 }
 0x111   :  { %v234_v36 = vpack.c.bf16 %v225_v35, %v222_v33  ;;  %v585_v37 = vpop.f32.mrb[7].mxu0 }
 0x113   :  { %630 = vtanh.bf16 %v234_v36 }
 0x115   :  { %v627_v20 = vpop.eup %626 }
 0x116   :  { %v629_v21 = vpop.eup %628  ;;  %v537_v22 = vcombine.low %v627_v20, %v627_v20  ;;  %v538_v23 = vcombine.high %v627_v20, %v627_v20 }
 0x117   :  { %v231_v24 = vmul.bf16 1043676725, %v629_v21 }
 0x118   :  { %253 = vst.msk [vmem:[#allocation3] sm:$0xf] %vm243_vm2, %v537_v22  ;;  %254 = vst.msk [vmem:[#allocation3 + $0x4] sm:$0xf] %vm243_vm2, %v538_v23 }
 0x119   :  { %v535_v25 = vcombine.low %v231_v24, %v231_v24  ;;  %v536_v26 = vcombine.high %v231_v24, %v231_v24 }
 0x11b   :  { %244 = vst.msk [vmem:[#allocation2] sm:$0xf] %vm243_vm2, %v535_v25  ;;  %245 = vst.msk [vmem:[#allocation2 + $0x4] sm:$0xf] %vm243_vm2, %v536_v26 }
 0x11e   :  { %v631_v38 = vpop.eup %630 }
 0x11f   :  { %v271_v27 = vld [vmem:[#allocation3] sm:$0xf]  ;;  %v272_v28 = vld [vmem:[#allocation3 + $0x4] sm:$0xf]  ;;  %v539_v39 = vcombine.low %v631_v38, %v631_v38  ;;  %v540_v40 = vcombine.high %v631_v38, %v631_v38 }
 0x120   :  { %v280_v29 = vsel %vm68_vm1, %v271_v27, 0  ;;  %v326_v30 = vsel %vm68_vm1, %v272_v28, 0 }
 0x121   :  { %587 = vmatpush3.bf16.xpose.msra.mxu1 %v280_v29  ;;  %593 = vmatpush3.bf16.xpose.msra.mxu0 %v326_v30  ;;  %262 = vst.msk [vmem:[#allocation4] sm:$0xf] %vm243_vm2, %v539_v39  ;;  %263 = vst.msk [vmem:[#allocation4 + $0x4] sm:$0xf] %vm243_vm2, %v540_v40 }
 0x122   :  { %598 = vmatprep.subr.bf16.mxu1 %v742_v0  ;;  %604 = vmatprep.subr.bf16.mxu0 %v742_v0  ;;  %v269_v31 = vld [vmem:[#allocation2] sm:$0xf]  ;;  %v270_v32 = vld [vmem:[#allocation2 + $0x4] sm:$0xf] }
 0x128   :  { %589 = vmatmul.mubr.msk.bf16.vlgmr.msra.gmra.mrb[4].mxu1 %vm68_vm1, %v269_v31  ;;  %595 = vmatmul.mubr.msk.bf16.vlgmr.msra.gmra.mrb[8].mxu0 %vm68_vm1, %v270_v32  ;;  %v273_v41 = vld [vmem:[#allocation4] sm:$0xf]  ;;  %v274_v42 = vld [vmem:[#allocation4 + $0x4] sm:$0xf] }
 0x129   :  { %600 = vmatprep.mubr.msk.bf16.mxu1 %vm743_vm0, %v742_v0  ;;  %606 = vmatprep.mubr.msk.bf16.mxu0 %vm743_vm0, %v742_v0  ;;  %v398_v43 = vsel %vm396_vm3, %v273_v41, 0  ;;  %v444_v44 = vsel %vm396_vm3, %v274_v42, 0 }
 0x12a   :  { %599 = vmatpush3.bf16.msra.mxu1 %v398_v43  ;;  %605 = vmatpush3.bf16.msra.mxu0 %v444_v44 }
 0x1fb   :  { %v316_v45 = vpop.f32.mrb[4].mxu1  ;;  %v362_v46 = vpop.f32.mrb[8].mxu0 }
 0x1fc   :  { %v590_v47 = vpop.f32.mrb[5].mxu1  ;;  %v596_v48 = vpop.f32.mrb[9].mxu0  ;;  %v369_v49 = vsel %vm368_vm4, %v316_v45, -inf  ;;  %v372_v54 = vsel %vm368_vm4, %v362_v46, -inf }
 0x1fd   :  { %370 = vmax.xlane.f32.xlu0 %v369_v49  ;;  %v319_v50 = vpop.f32.mrb[6].mxu1  ;;  %v365_v51 = vpop.f32.mrb[10].mxu0 }
 0x1fe   :  { %v591_v52 = vpop.f32.mrb[7].mxu1  ;;  %v597_v53 = vpop.f32.mrb[11].mxu0 }
 0x201   :  { %373 = vmax.xlane.f32.xlu0 %v372_v54 }
 0x28a   :  { %v371_v55 = vpop.xlane.xlu0 %370 }
 0x28b   :  { %v375_v56 = vsub.f32 %v316_v45, %v371_v55 }
 0x28d   :  { %v377_v57 = vmul.f32 1.442695, %v375_v56 }
 0x28e   :  { %v374_v58 = vpop.xlane.xlu0 %373 }
 0x28f   :  { %632 = vpow2.f32 %v377_v57  ;;  %v376_v59 = vsub.f32 %v362_v46, %v374_v58 }
 0x291   :  { %v379_v60 = vmul.f32 1.442695, %v376_v59 }
 0x293   :  { %634 = vpow2.f32 %v379_v60 }
 0x299   :  { %v633_v61 = vpop.eup %632 }
 0x29a   :  { %v381_v62 = vsel %vm368_vm4, %v633_v61, 0.0 }
 0x29b   :  { %382 = vadd.xlane.f32.xlu1 %v381_v62 }
 0x29d   :  { %v635_v63 = vpop.eup %634 }
 0x29e   :  { %v384_v0 = vsel %vm368_vm4, %v635_v63, 0.0 }
 0x29f   :  { %385 = vadd.xlane.f32.xlu1 %v384_v0 }
 0x328   :  { %v383_v1 = vpop.xlane.xlu1 %382 }
 0x329   :  { %636 = vrcp.f32 %v383_v1 }
 0x32c   :  { %v386_v2 = vpop.xlane.xlu1 %385 }
 0x32d   :  { %638 = vrcp.f32 %v386_v2 }
 0x333   :  { %v637_v3 = vpop.eup %636 }
 0x334   :  { %v389_v4 = vmul.f32 %v637_v3, %v633_v61 }
 0x336   :  { %488 = vst.msk [vmem:[#allocation11] sm:$0xff] %vm368_vm4, %v389_v4  ;;  %v391_v5 = vpack.c.bf16 %v389_v4, %v389_v4 }
 0x337   :  { %v639_v6 = vpop.eup %638 }
 0x338   :  { %v390_v7 = vmul.f32 %v639_v6, %v635_v63  ;;  %601 = vmatmul.mubr.msk.bf16.vlgmr.msra.gmra.mrb[8].mxu1 %vm368_vm4, %v391_v5 }
 0x33a   :  { %489 = vst.msk [vmem:[#allocation11 + $0x8] sm:$0xff] %vm368_vm4, %v390_v7  ;;  %v392_v8 = vpack.c.bf16 %v390_v7, %v390_v7 }
 0x33c   :  { %607 = vmatmul.mubr.msk.bf16.vlgmr.msra.gmra.mrb[12].mxu0 %vm368_vm4, %v392_v8 }
 0x33d   :  { %695 = shalt.err (!%p692_p6)
}
 0x33e   :  { %s696_s16 = scalar_lea.hbm %s873_s3, 256 }
 0x33f   :  { %p697_p7 = scmp.ne.s32.totalorder %s873_s3, %s696_s16  ;;  %p700_p8 = scmp.lt.u32.totalorder %s696_s16, %s873_s3 }
 0x341   :  { %p702_p9 = pnand %p700_p8, %p697_p7 }
 0x343   :  { %705 = shalt.err (!%p702_p9)
}
 0x344   :  { %513 = dma.vmem_to_hbm [thread:$0]  %s508_s12, 256, %s873_s3, [#allocation12], %s737_s22, %s737_s22, %s738_s23  }
 0x345   :  { %s745_s25 = smov [#allocation10]  }
 0x346   :  { %s495_s26 = sshll.u32 %s745_s25, 4  ;;  %s496_s26 = int_to_ptr.vmem [resolvable:$true] %s495_s26 }
 0x347   :  { %s706_s27 = scalar_lea.vmem %s496_s26, 256  ;;  %p711_p11 = scmp.lt.s32.totalorder %s496_s26, %s496_s26 }
 0x348   :  { %p707_p10 = scmp.ne.s32.totalorder %s496_s26, %s706_s27  ;;  %p712_p12 = scmp.lt.s32.totalorder %s706_s27, %s706_s27 }
 0x34a   :  { %p713_p13 = por %p712_p12, %p711_p11 }
 0x34c   :  { %p714_p0 = pnand %p713_p13, %p707_p10 }
 0x40b   :  { %v434_v9 = vpop.f32.mrb[8].mxu1 }
 0x40c   :  { %486 = vst.msk [vmem:[#allocation10] sm:$0xff] %vm68_vm1, %v434_v9  ;;  %v602_v10 = vpop.f32.mrb[9].mxu1 }
 0x40d   :  { %v437_v11 = vpop.f32.mrb[10].mxu1 }
 0x40e   :  { %v603_v12 = vpop.f32.mrb[11].mxu1 }
 0x40f   :  { %v480_v13 = vpop.f32.mrb[12].mxu0 }
 0x410   :  { %487 = vst.msk [vmem:[#allocation10 + $0x8] sm:$0xff] %vm68_vm1, %v480_v13  ;;  %v608_v14 = vpop.f32.mrb[13].mxu0 }
 0x411   :  { %v483_v15 = vpop.f32.mrb[14].mxu0 }
 0x412   :  { %717 = shalt.err (!%p714_p0)
}
 0x413   :  { %s718_s29 = scalar_lea.hbm %s872_s2, 256 }
 0x414   :  { %p719_p1 = scmp.ne.s32.totalorder %s872_s2, %s718_s29  ;;  %p722_p2 = scmp.lt.u32.totalorder %s718_s29, %s872_s2 }
 0x416   :  { %p724_p3 = pnand %p722_p2, %p719_p1 }
 0x418   :  { %727 = shalt.err (!%p724_p3)
}
 0x419   :  { %501 = dma.vmem_to_hbm [thread:$0]  %s496_s26, 256, %s872_s2, [#allocation7], %s737_s22, %s737_s22, %s738_s23   ;;  %v609_v16 = vpop.f32.mrb[15].mxu0 }
 0x41a   :  { %732 = dma.done.wait [#allocation7], 256  }
 0x41b   :  { %733 = vsyncadd [#allocation7], 4294967040 }
 0x41c   :  { %734 = dma.done.wait [#allocation12], 256  }
 0x41d   :  { %735 = vsyncadd [#allocation12], 4294967040 }
 0x41e   :  { %520 = vsyncpa [#allocation6], 1 }
 0x41f   :  { %521 = vsyncpa [#allocation9], 1 }
 0x420   :  { %522 = vsyncpa [#allocation7], 1 }
 0x421   :  { %523 = vsyncpa [#allocation12], 1 }

</bundles_post_ra>
